<compile_context>
chip_gen: v5e
topology: v5e:2x2
jax: 0.10.0
libtpu: 0.0.40
codegen_flags: <defaults>
</compile_context>

<pallas_src>
import functools

import jax
import jax.numpy as jnp
from jax.experimental import pallas as pl
from jax.experimental.pallas import tpu as pltpu


# ----------------------------------------------------------------------------
# 1) Fused bidirectional LSTM.
#    wih_cat : (E, 8H)  = [fwd i|f|g|o , bwd i|f|g|o]   (bf16)
#    whh     : (2, H, 4H)  per-direction recurrent weights (bf16)
#    bias    : (2, 1, 4H)  fused b_ih + b_hh (f32)
#    Layouts are time-major; output is (S, B, 2H).
# ----------------------------------------------------------------------------
def bilstm_kernel(x_ref, m_ref, wih_ref, whh_ref, b_ref, out_ref,
                  gxf_sc, gxb_sc, fwd_sc, bwd_sc, *, seq_len, hidden):
    H = hidden
    S = seq_len
    TB = x_ref.shape[1]
    E = x_ref.shape[2]

    # --- Input projection for ALL timesteps and BOTH directions: one matmul. ---
    x2d = x_ref[...].reshape(S * TB, E).astype(jnp.bfloat16)
    gx = jnp.dot(x2d, wih_ref[...], preferred_element_type=jnp.float32)   # (S*TB, 8H)
    gxf_sc[...] = gx[:, 0:4 * H].reshape(S, TB, 4 * H)
    gxb_sc[...] = gx[:, 4 * H:8 * H].reshape(S, TB, 4 * H)

    whh_f = whh_ref[0]          # (H, 4H) bf16
    whh_b = whh_ref[1]
    bias_f = b_ref[0]           # (1, 4H) f32
    bias_b = b_ref[1]

    def cell(gx_t, h, c, whh, bias):
        g = gx_t + jnp.dot(h.astype(jnp.bfloat16), whh,
                           preferred_element_type=jnp.float32) + bias     # (TB, 4H)
        i = jax.nn.sigmoid(g[:, 0:H])
        f = jax.nn.sigmoid(g[:, H:2 * H])
        gg = jnp.tanh(g[:, 2 * H:3 * H])
        o = jax.nn.sigmoid(g[:, 3 * H:4 * H])
        c_new = f * c + i * gg
        h_new = o * jnp.tanh(c_new)
        return h_new, c_new

    zeros = jnp.zeros((TB, H), jnp.float32)

    def body(t, carry):
        hf, cf, hb, cb = carry
        rt = S - 1 - t
        keep_f = m_ref[t] > 0.0                      # (TB, 1)
        keep_b = m_ref[rt] > 0.0
        hfn, cfn = cell(gxf_sc[t], hf, cf, whh_f, bias_f)
        hbn, cbn = cell(gxb_sc[rt], hb, cb, whh_b, bias_b)
        # pad_packed semantics: padded steps keep state and emit zeros.
        fwd_sc[t] = jnp.where(keep_f, hfn, 0.0)
        bwd_sc[rt] = jnp.where(keep_b, hbn, 0.0)
        return (jnp.where(keep_f, hfn, hf), jnp.where(keep_f, cfn, cf),
                jnp.where(keep_b, hbn, hb), jnp.where(keep_b, cbn, cb))

    jax.lax.fori_loop(0, S, body, (zeros, zeros, zeros, zeros))

    # Two full-extent stores instead of 2*S per-timestep half-lane stores.
    out_ref[:, :, 0:H] = fwd_sc[...]
    out_ref[:, :, H:2 * H] = bwd_sc[...]


def bilstm(x_tm, m_tm, wih_cat, whh, bias, *, hidden, batch_block):
    """x_tm (S,B,E) f32, m_tm (S,B,1) f32.  Returns (S,B,2H) f32."""
    S, B, E = x_tm.shape
    H = hidden
    TB = batch_block
    kernel = functools.partial(bilstm_kernel, seq_len=S, hidden=H)
    return pl.pallas_call(
        kernel,
        out_shape=jax.ShapeDtypeStruct((S, B, 2 * H), jnp.float32),
        grid_spec=pltpu.PrefetchScalarGridSpec(
            num_scalar_prefetch=0,
            grid=(B // TB,),
            in_specs=[
                pl.BlockSpec((S, TB, E), lambda b: (0, b, 0)),
                pl.BlockSpec((S, TB, 1), lambda b: (0, b, 0)),
                pl.BlockSpec((E, 8 * H), lambda b: (0, 0)),
                pl.BlockSpec((2, H, 4 * H), lambda b: (0, 0, 0)),
                pl.BlockSpec((2, 1, 4 * H), lambda b: (0, 0, 0)),
            ],
            out_specs=pl.BlockSpec((S, TB, 2 * H), lambda b: (0, b, 0)),
            scratch_shapes=[
                pltpu.VMEM((S, TB, 4 * H), jnp.float32),   # fwd input gates
                pltpu.VMEM((S, TB, 4 * H), jnp.float32),   # bwd input gates
                pltpu.VMEM((S, TB, H), jnp.float32),       # fwd hidden states
                pltpu.VMEM((S, TB, H), jnp.float32),       # bwd hidden states
            ],
        ),
        compiler_params=pltpu.CompilerParams(
            dimension_semantics=("parallel",),
            vmem_limit_bytes=32 * 1024 * 1024),
    )(x_tm, m_tm, wih_cat, whh, bias)


# ----------------------------------------------------------------------------
# 2) Fused GAT: single flattened batch-major grid of size 3*B (g = i%3, b = i//3
#    -> x stays resident across the 3 graphs of one batch element).  Layer-1
#    head weights are stacked into one (F, nheads*nhid) matmul; all heads'
#    f1/f2 attention projections come from two block-diagonal matmuls; the
#    head-concat is folded into the layer-2 matmul as a block-sum.
# ----------------------------------------------------------------------------
def gat_kernel(x_ref, adj_ref, w1_ref, a1c_ref, a2c_ref, wo_ref, ao1_ref, ao2_ref,
               out_ref, *, nheads, nhid, alpha):
    x = x_ref[0]                # (N, F) bf16
    adj = adj_ref[0, 0]         # (N, N) bf16 (only compared with > 0)
    w1 = w1_ref[0]              # (F, HH) bf16
    a1c = a1c_ref[0]            # (HH, nheads) f32, block-diagonal
    a2c = a2c_ref[0]            # (HH, nheads) f32, block-diagonal
    wo = wo_ref[0]              # (HH, Lp) bf16
    ao1 = ao1_ref[0]            # (Lp, 1) f32
    ao2 = ao2_ref[0]            # (Lp, 1) f32
    N = adj.shape[0]
    Lp = wo.shape[-1]
    neg = jnp.float32(-9e15)

    def masked_softmax(e):
        e = jnp.where(e > 0.0, e, alpha * e)                       # LeakyReLU
        e = jnp.where(adj > 0, e, neg)
        mx = jnp.max(e, axis=-1, keepdims=True)
        p = jnp.exp(e - mx)
        return p / jnp.sum(p, axis=-1, keepdims=True)              # exact divide

    def elu(v):
        return jnp.where(v > 0.0, v, jnp.exp(v) - 1.0)

    # Layer 1: all heads' projections in one matmul.
    wh_all = jnp.dot(x, w1, preferred_element_type=jnp.float32)    # (N, HH) f32
    # All heads' attention vectors in two block-diagonal matmuls.
    f1_all = jnp.dot(wh_all, a1c, preferred_element_type=jnp.float32)          # (N, nheads)
    f2_all = jax.lax.dot_general(a2c, wh_all, (((0,), (1,)), ((), ())),
                                 preferred_element_type=jnp.float32)           # (nheads, N)

    # Per-head attention; head-concat folded into the layer-2 matmul (block-sum).
    wh2 = jnp.zeros((N, Lp), jnp.float32)
    for h in range(nheads):
        sl = slice(h * nhid, (h + 1) * nhid)
        att = masked_softmax(f1_all[:, h:h + 1] + f2_all[h:h + 1, :])          # (N, N)
        hp = jnp.dot(att.astype(jnp.bfloat16), wh_all[:, sl].astype(jnp.bfloat16),
                     preferred_element_type=jnp.float32)                       # (N, nhid)
        hp = elu(hp)
        wh2 = wh2 + jnp.dot(hp.astype(jnp.bfloat16), wo[sl, :],
                            preferred_element_type=jnp.float32)                # (N, Lp)

    # Layer 2 (single output head, concat=False) + outer F.elu.
    f1 = jnp.dot(wh2, ao1, preferred_element_type=jnp.float32)                 # (N, 1)
    f2 = jax.lax.dot_general(ao2, wh2, (((0,), (1,)), ((), ())),
                             preferred_element_type=jnp.float32)               # (1, N)
    att = masked_softmax(f1 + f2)
    out = jnp.dot(att.astype(jnp.bfloat16), wh2.astype(jnp.bfloat16),
                  preferred_element_type=jnp.float32)                          # (N, Lp)
    out_ref[0, 0] = elu(out)


def gat_all(gat_input, adj_stack, w1, a1c, a2c, wo, ao1, ao2, *, nheads, nhid, alpha):
    """gat_input (B,N,F) bf16; adj_stack (3,B,N,N) bf16.  Returns (3,B,N,Lp) f32."""
    B, N, F = gat_input.shape
    HH = w1.shape[-1]
    Lp = wo.shape[-1]
    kernel = functools.partial(gat_kernel, nheads=nheads, nhid=nhid, alpha=alpha)
    # Flattened batch-major grid: i -> (b = i // 3, g = i % 3).
    return pl.pallas_call(
        kernel,
        out_shape=jax.ShapeDtypeStruct((3, B, N, Lp), jnp.float32),
        grid_spec=pltpu.PrefetchScalarGridSpec(
            num_scalar_prefetch=0,
            grid=(B * 3,),
            in_specs=[
                pl.BlockSpec((1, N, F), lambda i: (i // 3, 0, 0)),
                pl.BlockSpec((1, 1, N, N), lambda i: (i % 3, i // 3, 0, 0)),
                pl.BlockSpec((1, F, HH), lambda i: (i % 3, 0, 0)),
                pl.BlockSpec((1, HH, nheads), lambda i: (i % 3, 0, 0)),
                pl.BlockSpec((1, HH, nheads), lambda i: (i % 3, 0, 0)),
                pl.BlockSpec((1, HH, Lp), lambda i: (i % 3, 0, 0)),
                pl.BlockSpec((1, Lp, 1), lambda i: (i % 3, 0, 0)),
                pl.BlockSpec((1, Lp, 1), lambda i: (i % 3, 0, 0)),
            ],
            out_specs=pl.BlockSpec((1, 1, N, Lp), lambda i: (i % 3, i // 3, 0, 0)),
        ),
        compiler_params=pltpu.CompilerParams(
            dimension_semantics=("parallel",),
            vmem_limit_bytes=32 * 1024 * 1024),
    )(gat_input, adj_stack, w1, a1c, a2c, wo, ao1, ao2)


# ----------------------------------------------------------------------------
# 3) Fused combine (hidden2hidden + strategy 'v') + CRF Viterbi forward DP.
#    crf_feat for all timesteps is precomputed (one big matmul + weighted sum)
#    into a time-major VMEM buffer; the DP loop is a lax.fori_loop that only
#    reads feat_sc[t].  transT[to, from] = transitions[from, to].
# ----------------------------------------------------------------------------
def crf_forward_kernel(lstm_ref, gat_ref, w2h_ref, b2h_ref, wstk_ref, m_ref,
                       transT_ref, start_ref, bp_ref, part_ref, feat_sc, *, seq_len):
    S = seq_len
    TB = lstm_ref.shape[1]
    Hd = lstm_ref.shape[2]
    Lp = transT_ref.shape[0]

    # --- Precompute crf_feat for ALL timesteps (no per-t matmuls / slices). ---
    lf = jnp.dot(lstm_ref[...].reshape(S * TB, Hd).astype(jnp.bfloat16),
                 w2h_ref[...], preferred_element_type=jnp.float32) + b2h_ref[...]
    lf = (lf * wstk_ref[0]).reshape(S, TB, Lp)
    gsum = (gat_ref[0] * wstk_ref[1] + gat_ref[1] * wstk_ref[2]
            + gat_ref[2] * wstk_ref[3])                                        # (S, TB, Lp)
    feat_sc[...] = lf + gsum

    # --- Viterbi forward DP; loop invariants hoisted. ---
    transT_b = transT_ref[...][None, :, :]                                     # (1, Lp, Lp)
    idxs = jax.lax.broadcasted_iota(jnp.int32, (TB, Lp, Lp), 2)

    partition0 = feat_sc[0] + start_ref[...]                                   # (TB, Lp)
    bp_ref[0] = jnp.zeros((TB, Lp), jnp.int32)

    def body(t, partition):
        feat_t = feat_sc[t]                                                    # (TB, Lp)
        # cur[b, to, frm] = partition[b, frm] + trans[frm, to] + feat[b, to]
        cur = partition[:, None, :] + transT_b + feat_t[:, :, None]
        new_part = jnp.max(cur, axis=-1)                                       # (TB, Lp)
        bp = jnp.min(jnp.where(cur >= new_part[..., None], idxs, Lp),
                     axis=-1).astype(jnp.int32)                                # first max idx
        keep = m_ref[t] > 0.0                                                  # (TB, 1)
        bp_ref[t] = jnp.where(keep, bp, 0)                                     # NCRF++ masks bp to 0
        return jnp.where(keep, new_part, partition)

    part_ref[...] = jax.lax.fori_loop(1, S, body, partition0)


def combine_viterbi(lstm_tm, gat_tm, w2h_T, b2h, w_stack, mask_tm, transT, start_row,
                    *, batch_block):
    """lstm_tm (S,B,Hd), gat_tm (3,S,B,Lp) time-major."""
    S, B, Hd = lstm_tm.shape
    Lp = transT.shape[0]
    TB = batch_block
    kernel = functools.partial(crf_forward_kernel, seq_len=S)
    return pl.pallas_call(
        kernel,
        out_shape=(jax.ShapeDtypeStruct((S, B, Lp), jnp.int32),
                   jax.ShapeDtypeStruct((B, Lp), jnp.float32)),
        grid_spec=pltpu.PrefetchScalarGridSpec(
            num_scalar_prefetch=0,
            grid=(B // TB,),
            in_specs=[
                pl.BlockSpec((S, TB, Hd), lambda b: (0, b, 0)),
                pl.BlockSpec((3, S, TB, Lp), lambda b: (0, 0, b, 0)),
                pl.BlockSpec((Hd, Lp), lambda b: (0, 0)),
                pl.BlockSpec((1, Lp), lambda b: (0, 0)),
                pl.BlockSpec((4, 1, Lp), lambda b: (0, 0, 0)),
                pl.BlockSpec((S, TB, 1), lambda b: (0, b, 0)),
                pl.BlockSpec((Lp, Lp), lambda b: (0, 0)),
                pl.BlockSpec((1, Lp), lambda b: (0, 0)),
            ],
            out_specs=[pl.BlockSpec((S, TB, Lp), lambda b: (0, b, 0)),
                       pl.BlockSpec((TB, Lp), lambda b: (b, 0))],
            scratch_shapes=[pltpu.VMEM((S, TB, Lp), jnp.float32)],
        ),
        compiler_params=pltpu.CompilerParams(
            dimension_semantics=("parallel",),
            vmem_limit_bytes=32 * 1024 * 1024),
    )(lstm_tm, gat_tm, w2h_T, b2h, w_stack, mask_tm, transT, start_row)


def viterbi_backtrack(bp, last_part, mask, transitions, stop_idx):
    """bp (S,B,Lp) int32, last_part (B,Lp).  Matches NCRF++ _viterbi_decode."""
    S, B, Lp = bp.shape
    lengths = jnp.sum(mask.astype(jnp.int32), axis=1)                          # (B,)
    last_pos = lengths - 1
    pointer = jnp.argmax(last_part + transitions[:, stop_idx][None, :], axis=1).astype(jnp.int32)

    # back_points[k] corresponds to bp at time k+1; last slot is pad_zero
    back_points = jnp.concatenate([bp[1:], jnp.zeros((1, B, Lp), jnp.int32)], axis=0)
    batch_idx = jnp.arange(B)
    back_points = back_points.at[last_pos, batch_idx, :].set(pointer[:, None])

    decode = jnp.zeros((S, B), jnp.int32).at[S - 1].set(pointer)

    def body(ptr, k):
        ptr = back_points[k][batch_idx, ptr]
        return ptr, ptr

    ks = jnp.arange(S - 2, -1, -1)
    _, dec = jax.lax.scan(body, pointer, ks)
    decode = decode.at[ks].set(dec)
    return jnp.transpose(decode)                                               # (B, S)


# ----------------------------------------------------------------------------
# Full forward (strategy 'v', bilstm_flag=True, lstm_layer=1, gat_layer=2).
# ----------------------------------------------------------------------------
def blstm_gat_crf_forward(params, batch_char, gaz_list, t_graph, c_graph, l_graph, mask,
                          alpha=0.2, nheads=2, nhid=16):
    char_emb = params["char_emb"][batch_char].astype(jnp.float32)              # (B,S,E)
    gaz_emb = params["gaz_emb"][gaz_list].astype(jnp.float32)                  # (B,G,Hd)
    B, S, _ = char_emb.shape
    mask_f = mask.astype(jnp.float32)
    # self.dropout / gaz_dropout / droplstm / dropgat: identity at inference

    # Time-major layouts for the recurrent kernels.
    x_tm = jnp.transpose(char_emb, (1, 0, 2))                                  # (S,B,E)
    m_tm = jnp.transpose(mask_f)[..., None]                                    # (S,B,1)

    # Batch block for the recurrent kernels (full batch here; multiples of 8 at scale).
    TB = 8 if (B > 8 and B % 8 == 0) else B

    H = params["lstm_whh"].shape[1]
    lstm_tm = bilstm(x_tm, m_tm,
                     params["lstm_wih_cat"].astype(jnp.bfloat16),
                     params["lstm_whh"].astype(jnp.bfloat16),
                     params["lstm_b"],
                     hidden=H, batch_block=TB)                                 # (S,B,Hd)

    lstm_feature = jnp.transpose(lstm_tm, (1, 0, 2))                           # (B,S,Hd)
    gat_input = jnp.concatenate([lstm_feature, gaz_emb], axis=1).astype(jnp.bfloat16)
    adj_stack = jnp.stack([t_graph, c_graph, l_graph], axis=0).astype(jnp.bfloat16)

    gat_out = gat_all(gat_input, adj_stack,
                      params["gat_w1"].astype(jnp.bfloat16),
                      params["gat_a1cat"], params["gat_a2cat"],
                      params["gat_wo"].astype(jnp.bfloat16),
                      params["gat_ao1"], params["gat_ao2"],
                      nheads=nheads, nhid=nhid, alpha=alpha)                   # (3,B,N,Lp)

    # Only the first S node rows feed the CRF; make them time-major for the DP.
    gat_tm = jnp.transpose(gat_out[:, :, :S, :], (0, 2, 1, 3))                 # (3,S,B,Lp)

    transitions = params["transitions"]                                        # (Lp,Lp) padded
    L = params["num_tags"]                                                     # real tag count
    transT = jnp.transpose(transitions)                                        # [to, from]
    start_row = transitions[L - 2][None, :]                                    # (1, Lp)

    bp, last_part = combine_viterbi(lstm_tm, gat_tm,
                                    params["h2h_W_T"].astype(jnp.bfloat16),
                                    params["h2h_b"], params["w_stack"],
                                    m_tm, transT, start_row, batch_block=TB)
    return viterbi_backtrack(bp, last_part, mask, transitions, stop_idx=L - 1)


# ----------------------------------------------------------------------------
# Deterministic parameter init (shapes follow the module __init__), pre-fused
# and padded: label dim L padded to Lp=128 lanes (padded tags: -1e4 transitions,
# zero emissions).
# ----------------------------------------------------------------------------
def init_params(key, char_vocab, gaz_vocab, char_emb_dim, gaz_emb_dim,
                label_size, nhid, nheads):
    hidden_dim = gaz_emb_dim
    lstm_hidden = hidden_dim // 2
    L = label_size + 1                      # crf_input_dim = label_alphabet.size() + 1
    Lp = ((L + 127) // 128) * 128           # lane-dense padded label dim
    HH = nheads * nhid
    keys = list(jax.random.split(key, 40))
    it = iter(keys)
    nrm = lambda shape, s=0.1: s * jax.random.normal(next(it), shape, jnp.float32)

    scale_c = (3.0 / char_emb_dim) ** 0.5
    scale_g = (3.0 / gaz_emb_dim) ** 0.5

    # Block-diagonal per-head attention-projection matrices (heads on lanes).
    a1 = nrm((3, nheads, nhid))
    a2 = nrm((3, nheads, nhid))
    a1cat = jnp.zeros((3, HH, nheads), jnp.float32)
    a2cat = jnp.zeros((3, HH, nheads), jnp.float32)
    for h in range(nheads):
        a1cat = a1cat.at[:, h * nhid:(h + 1) * nhid, h].set(a1[:, h, :])
        a2cat = a2cat.at[:, h * nhid:(h + 1) * nhid, h].set(a2[:, h, :])

    def pad_last(x, to):
        return jnp.pad(x, [(0, 0)] * (x.ndim - 1) + [(0, to - x.shape[-1])])

    gat_wo = pad_last(nrm((3, HH, L)), Lp)
    gat_ao1 = jnp.pad(nrm((3, L, 1)), ((0, 0), (0, Lp - L), (0, 0)))
    gat_ao2 = jnp.pad(nrm((3, L, 1)), ((0, 0), (0, Lp - L), (0, 0)))
    h2h_W_T = pad_last(nrm((hidden_dim, L)), Lp)

    # CRF transitions (tag_size = L with START = L-2, STOP = L-1); padded tags
    # get -1e4 everywhere so they can never be selected by the Viterbi max.
    trans = nrm((L, L))
    trans = trans.at[:, L - 2].set(-10000.0)            # no transition TO start
    trans = trans.at[L - 1, :].set(-10000.0)            # no transition FROM stop
    transitions = jnp.full((Lp, Lp), -10000.0, jnp.float32)
    transitions = transitions.at[:L, :L].set(trans)

    params = {
        "char_emb": jax.random.uniform(next(it), (char_vocab, char_emb_dim),
                                       jnp.float32, -scale_c, scale_c),
        "gaz_emb": jax.random.uniform(next(it), (gaz_vocab, gaz_emb_dim),
                                      jnp.float32, -scale_g, scale_g),
        # Fused bidirectional LSTM: columns [0:4H]=fwd, [4H:8H]=bwd, gate order
        # [i|f|g|o] (PyTorch) along each 4H block.
        "lstm_wih_cat": nrm((char_emb_dim, 8 * lstm_hidden)),
        "lstm_whh": nrm((2, lstm_hidden, 4 * lstm_hidden)),
        "lstm_b": nrm((2, 1, 4 * lstm_hidden)),          # b_ih + b_hh, fused
        # 3 GATs (t/c/l graphs); heads stacked along the feature axis.
        "gat_w1": nrm((3, hidden_dim, HH)),
        "gat_a1cat": a1cat,
        "gat_a2cat": a2cat,
        "gat_wo": gat_wo,
        "gat_ao1": gat_ao1,
        "gat_ao2": gat_ao2,
        "h2h_W_T": h2h_W_T,                              # hidden2hidden weight^T, padded
        "h2h_b": jnp.zeros((1, Lp), jnp.float32),
        "w_stack": jnp.ones((4, 1, Lp), jnp.float32),    # strategy 'v' weights, init ones
        "transitions": transitions,
        "num_tags": L,
    }
    return params


# ----------------------------------------------------------------------------
if __name__ == "__main__":
    B, S, G = 2, 8, 6
    CHAR_VOCAB, GAZ_VOCAB = 50, 40
    CHAR_EMB, GAZ_EMB = 32, 64            # hidden_dim = gaz_emb_dim = 64
    LABEL_SIZE = 6                        # data.label_alphabet.size()
    NHID, NHEADS, ALPHA = 16, 2, 0.2
    N = S + G

    root = jax.random.PRNGKey(0)
    kp, k1, k2, k3, k4, k5 = jax.random.split(root, 6)

    params = init_params(kp, CHAR_VOCAB, GAZ_VOCAB, CHAR_EMB, GAZ_EMB,
                         LABEL_SIZE, NHID, NHEADS)

    batch_len = jnp.array([S, 6], jnp.int32)                      # sorted descending
    mask = (jnp.arange(S)[None, :] < batch_len[:, None]).astype(jnp.int32)
    batch_char = jax.random.randint(k1, (B, S), 1, CHAR_VOCAB) * mask
    gaz_list = jax.random.randint(k2, (B, G), 1, GAZ_VOCAB)

    def make_graph(k):
        g = jax.random.bernoulli(k, 0.3, (B, N, N)).astype(jnp.float32)
        return jnp.maximum(g, jnp.eye(N, dtype=jnp.float32)[None])

    t_graph = make_graph(k3)
    c_graph = make_graph(k4)
    l_graph = make_graph(k5)

    best_path = blstm_gat_crf_forward(params, batch_char, gaz_list,
                                      t_graph, c_graph, l_graph, mask,
                                      alpha=ALPHA, nheads=NHEADS, nhid=NHID)
    jax.block_until_ready(best_path)
    assert best_path.shape == (B, S)
    print("KERNEL_OK")
</pallas_src>

<mosaic_0001>
module attributes {stable_mosaic.version = 11 : i64} {
  func.func @bilstm_kernel(%arg0: i32, %arg1: memref<8x2x32xf32, #tpu.memory_space<vmem>>, %arg2: memref<8x2x1xf32, #tpu.memory_space<vmem>>, %arg3: memref<32x256xbf16, #tpu.memory_space<vmem>>, %arg4: memref<2x32x128xbf16, #tpu.memory_space<vmem>>, %arg5: memref<2x1x128xf32, #tpu.memory_space<vmem>>, %arg6: memref<8x2x64xf32, #tpu.memory_space<vmem>>, %arg7: memref<8x2x128xf32, #tpu.memory_space<vmem>>, %arg8: memref<8x2x128xf32, #tpu.memory_space<vmem>>, %arg9: memref<8x2x32xf32, #tpu.memory_space<vmem>>, %arg10: memref<8x2x32xf32, #tpu.memory_space<vmem>>) attributes {dimension_semantics = [#tpu.dimension_semantics<parallel>], iteration_bounds = array<i64: 1>, scalar_prefetch = 0 : i64, scratch_operands = 4 : i64, tpu.core_type = #tpu.core_type<tc>, window_params = [{transform_indices = @transform_0, window_bounds = array<i64: 8, 2, 32>}, {transform_indices = @transform_1, window_bounds = array<i64: 8, 2, 1>}, {pipeline_mode = #tpu.pipeline_mode<synchronous>, transform_indices = @transform_2, window_bounds = array<i64: 32, 256>}, {pipeline_mode = #tpu.pipeline_mode<synchronous>, transform_indices = @transform_3, window_bounds = array<i64: 2, 32, 128>}, {pipeline_mode = #tpu.pipeline_mode<synchronous>, transform_indices = @transform_4, window_bounds = array<i64: 2, 1, 128>}, {transform_indices = @transform_5, window_bounds = array<i64: 8, 2, 64>}]} {
    %c0 = arith.constant 0 : index
    %c0_0 = arith.constant 0 : index
    %c0_1 = arith.constant 0 : index
    %0 = vector.load %arg1[%c0, %c0_0, %c0_1] : memref<8x2x32xf32, #tpu.memory_space<vmem>>, vector<8x2x32xf32>
    %1 = vector.shape_cast %0 : vector<8x2x32xf32> to vector<16x32xf32>
    %2 = arith.truncf %1 : vector<16x32xf32> to vector<16x32xbf16>
    %c0_2 = arith.constant 0 : index
    %c0_3 = arith.constant 0 : index
    %3 = vector.load %arg3[%c0_2, %c0_3] : memref<32x256xbf16, #tpu.memory_space<vmem>>, vector<32x256xbf16>
    %cst = arith.constant dense<0.000000e+00> : vector<16x256xf32>
    %4 = tpu.matmul %2, %3, %cst {dimension_numbers = #tpu.dot_dimension_numbers<[1], [0], [0], [1], [0, 0, 1, 1], [], []>} : vector<16x32xbf16>, vector<32x256xbf16>, vector<16x256xf32> -> vector<16x256xf32>
    %5 = vector.extract_strided_slice %4 {offsets = [0, 0], sizes = [16, 128], strides = [1, 1]} : vector<16x256xf32> to vector<16x128xf32>
    %6 = vector.shape_cast %5 : vector<16x128xf32> to vector<8x2x128xf32>
    %c0_4 = arith.constant 0 : index
    %c0_5 = arith.constant 0 : index
    %c0_6 = arith.constant 0 : index
    %7 = vector.load %arg7[%c0_4, %c0_5, %c0_6] : memref<8x2x128xf32, #tpu.memory_space<vmem>>, vector<8x2x128xf32>
    tpu.vector_store %arg7[%c0_4, %c0_5, %c0_6], %6 {strides = array<i32>} : memref<8x2x128xf32, #tpu.memory_space<vmem>>, vector<8x2x128xf32>,
    %8 = vector.extract_strided_slice %4 {offsets = [0, 128], sizes = [16, 128], strides = [1, 1]} : vector<16x256xf32> to vector<16x128xf32>
    %9 = vector.shape_cast %8 : vector<16x128xf32> to vector<8x2x128xf32>
    %c0_7 = arith.constant 0 : index
    %c0_8 = arith.constant 0 : index
    %c0_9 = arith.constant 0 : index
    %10 = vector.load %arg8[%c0_7, %c0_8, %c0_9] : memref<8x2x128xf32, #tpu.memory_space<vmem>>, vector<8x2x128xf32>
    tpu.vector_store %arg8[%c0_7, %c0_8, %c0_9], %9 {strides = array<i32>} : memref<8x2x128xf32, #tpu.memory_space<vmem>>, vector<8x2x128xf32>,
    %c0_10 = arith.constant 0 : index
    %c0_11 = arith.constant 0 : index
    %c0_12 = arith.constant 0 : index
    %11 = vector.load %arg4[%c0_10, %c0_11, %c0_12] : memref<2x32x128xbf16, #tpu.memory_space<vmem>>, vector<1x32x128xbf16>
    %12 = vector.shape_cast %11 : vector<1x32x128xbf16> to vector<32x128xbf16>
    %c1 = arith.constant 1 : index
    %c0_13 = arith.constant 0 : index
    %c0_14 = arith.constant 0 : index
    %13 = vector.load %arg4[%c1, %c0_13, %c0_14] : memref<2x32x128xbf16, #tpu.memory_space<vmem>>, vector<1x32x128xbf16>
    %14 = vector.shape_cast %13 : vector<1x32x128xbf16> to vector<32x128xbf16>
    %c0_15 = arith.constant 0 : index
    %c0_16 = arith.constant 0 : index
    %c0_17 = arith.constant 0 : index
    %15 = vector.load %arg5[%c0_15, %c0_16, %c0_17] : memref<2x1x128xf32, #tpu.memory_space<vmem>>, vector<1x1x128xf32>
    %16 = vector.shape_cast %15 : vector<1x1x128xf32> to vector<1x128xf32>
    %c1_18 = arith.constant 1 : index
    %c0_19 = arith.constant 0 : index
    %c0_20 = arith.constant 0 : index
    %17 = vector.load %arg5[%c1_18, %c0_19, %c0_20] : memref<2x1x128xf32, #tpu.memory_space<vmem>>, vector<1x1x128xf32>
    %18 = vector.shape_cast %17 : vector<1x1x128xf32> to vector<1x128xf32>
    %cst_21 = arith.constant 0.000000e+00 : f32
    %19 = vector.broadcast %cst_21 : f32 to vector<2x32xf32>
    %c0_i32 = arith.constant 0 : i32
    %c8_i32 = arith.constant 8 : i32
    %20 = arith.addi %c0_i32, %c8_i32 : i32
    %c1_i32 = arith.constant 1 : i32
    %21:4 = scf.for %arg11 = %c0_i32 to %20 step %c1_i32 iter_args(%arg12 = %19, %arg13 = %19, %arg14 = %19, %arg15 = %19) -> (vector<2x32xf32>, vector<2x32xf32>, vector<2x32xf32>, vector<2x32xf32>)  : i32 {
      %c7_i32 = arith.constant 7 : i32
      %26 = arith.subi %c7_i32, %arg11 : i32
      %27 = arith.index_cast %arg11 : i32 to index
      %c0_34 = arith.constant 0 : index
      %c0_35 = arith.constant 0 : index
      %28 = vector.load %arg2[%27, %c0_34, %c0_35] : memref<8x2x1xf32, #tpu.memory_space<vmem>>, vector<1x2x1xf32>
      %29 = vector.shape_cast %28 : vector<1x2x1xf32> to vector<2x1xf32>
      %cst_36 = arith.constant 0.000000e+00 : f32
      %30 = vector.broadcast %cst_36 : f32 to vector<2x1xf32>
      %31 = arith.cmpf ogt, %29, %30 : vector<2x1xf32>
      %32 = arith.index_cast %26 : i32 to index
      %c0_37 = arith.constant 0 : index
      %c0_38 = arith.constant 0 : index
      %33 = vector.load %arg2[%32, %c0_37, %c0_38] : memref<8x2x1xf32, #tpu.memory_space<vmem>>, vector<1x2x1xf32>
      %34 = vector.shape_cast %33 : vector<1x2x1xf32> to vector<2x1xf32>
      %cst_39 = arith.constant 0.000000e+00 : f32
      %35 = vector.broadcast %cst_39 : f32 to vector<2x1xf32>
      %36 = arith.cmpf ogt, %34, %35 : vector<2x1xf32>
      %37 = arith.index_cast %arg11 : i32 to index
      %c0_40 = arith.constant 0 : index
      %c0_41 = arith.constant 0 : index
      %38 = vector.load %arg7[%37, %c0_40, %c0_41] : memref<8x2x128xf32, #tpu.memory_space<vmem>>, vector<1x2x128xf32>
      %39 = vector.shape_cast %38 : vector<1x2x128xf32> to vector<2x128xf32>
      %40 = arith.truncf %arg12 : vector<2x32xf32> to vector<2x32xbf16>
      %cst_42 = arith.constant dense<0.000000e+00> : vector<2x128xf32>
      %41 = tpu.matmul %40, %12, %cst_42 {dimension_numbers = #tpu.dot_dimension_numbers<[1], [0], [0], [1], [0, 0, 1, 1], [], []>} : vector<2x32xbf16>, vector<32x128xbf16>, vector<2x128xf32> -> vector<2x128xf32>
      %42 = arith.addf %39, %41 : vector<2x128xf32>
      %43 = vector.broadcast %16 : vector<1x128xf32> to vector<2x128xf32>
      %44 = arith.addf %42, %43 : vector<2x128xf32>
      %45 = vector.extract_strided_slice %44 {offsets = [0, 0], sizes = [2, 32], strides = [1, 1]} : vector<2x128xf32> to vector<2x32xf32>
      %46 = arith.negf %45 : vector<2x32xf32>
      %47 = math.exp %46 : vector<2x32xf32>
      %cst_43 = arith.constant 1.000000e+00 : f32
      %48 = vector.broadcast %cst_43 : f32 to vector<2x32xf32>
      %49 = arith.addf %48, %47 : vector<2x32xf32>
      %50 = arith.divf %48, %49 : vector<2x32xf32>
      %51 = vector.extract_strided_slice %44 {offsets = [0, 32], sizes = [2, 32], strides = [1, 1]} : vector<2x128xf32> to vector<2x32xf32>
      %52 = arith.negf %51 : vector<2x32xf32>
      %53 = math.exp %52 : vector<2x32xf32>
      %cst_44 = arith.constant 1.000000e+00 : f32
      %54 = vector.broadcast %cst_44 : f32 to vector<2x32xf32>
      %55 = arith.addf %54, %53 : vector<2x32xf32>
      %56 = arith.divf %54, %55 : vector<2x32xf32>
      %57 = vector.extract_strided_slice %44 {offsets = [0, 64], sizes = [2, 32], strides = [1, 1]} : vector<2x128xf32> to vector<2x32xf32>
      %58 = math.tanh %57 : vector<2x32xf32>
      %59 = vector.extract_strided_slice %44 {offsets = [0, 96], sizes = [2, 32], strides = [1, 1]} : vector<2x128xf32> to vector<2x32xf32>
      %60 = arith.negf %59 : vector<2x32xf32>
      %61 = math.exp %60 : vector<2x32xf32>
      %cst_45 = arith.constant 1.000000e+00 : f32
      %62 = vector.broadcast %cst_45 : f32 to vector<2x32xf32>
      %63 = arith.addf %62, %61 : vector<2x32xf32>
      %64 = arith.divf %62, %63 : vector<2x32xf32>
      %65 = arith.mulf %56, %arg13 : vector<2x32xf32>
      %66 = arith.mulf %50, %58 : vector<2x32xf32>
      %67 = arith.addf %65, %66 : vector<2x32xf32>
      %68 = math.tanh %67 : vector<2x32xf32>
      %69 = arith.mulf %64, %68 : vector<2x32xf32>
      %70 = arith.index_cast %26 : i32 to index
      %c0_46 = arith.constant 0 : index
      %c0_47 = arith.constant 0 : index
      %71 = vector.load %arg8[%70, %c0_46, %c0_47] : memref<8x2x128xf32, #tpu.memory_space<vmem>>, vector<1x2x128xf32>
      %72 = vector.shape_cast %71 : vector<1x2x128xf32> to vector<2x128xf32>
      %73 = arith.truncf %arg14 : vector<2x32xf32> to vector<2x32xbf16>
      %cst_48 = arith.constant dense<0.000000e+00> : vector<2x128xf32>
      %74 = tpu.matmul %73, %14, %cst_48 {dimension_numbers = #tpu.dot_dimension_numbers<[1], [0], [0], [1], [0, 0, 1, 1], [], []>} : vector<2x32xbf16>, vector<32x128xbf16>, vector<2x128xf32> -> vector<2x128xf32>
      %75 = arith.addf %72, %74 : vector<2x128xf32>
      %76 = vector.broadcast %18 : vector<1x128xf32> to vector<2x128xf32>
      %77 = arith.addf %75, %76 : vector<2x128xf32>
      %78 = vector.extract_strided_slice %77 {offsets = [0, 0], sizes = [2, 32], strides = [1, 1]} : vector<2x128xf32> to vector<2x32xf32>
      %79 = arith.negf %78 : vector<2x32xf32>
      %80 = math.exp %79 : vector<2x32xf32>
      %cst_49 = arith.constant 1.000000e+00 : f32
      %81 = vector.broadcast %cst_49 : f32 to vector<2x32xf32>
      %82 = arith.addf %81, %80 : vector<2x32xf32>
      %83 = arith.divf %81, %82 : vector<2x32xf32>
      %84 = vector.extract_strided_slice %77 {offsets = [0, 32], sizes = [2, 32], strides = [1, 1]} : vector<2x128xf32> to vector<2x32xf32>
      %85 = arith.negf %84 : vector<2x32xf32>
      %86 = math.exp %85 : vector<2x32xf32>
      %cst_50 = arith.constant 1.000000e+00 : f32
      %87 = vector.broadcast %cst_50 : f32 to vector<2x32xf32>
      %88 = arith.addf %87, %86 : vector<2x32xf32>
      %89 = arith.divf %87, %88 : vector<2x32xf32>
      %90 = vector.extract_strided_slice %77 {offsets = [0, 64], sizes = [2, 32], strides = [1, 1]} : vector<2x128xf32> to vector<2x32xf32>
      %91 = math.tanh %90 : vector<2x32xf32>
      %92 = vector.extract_strided_slice %77 {offsets = [0, 96], sizes = [2, 32], strides = [1, 1]} : vector<2x128xf32> to vector<2x32xf32>
      %93 = arith.negf %92 : vector<2x32xf32>
      %94 = math.exp %93 : vector<2x32xf32>
      %cst_51 = arith.constant 1.000000e+00 : f32
      %95 = vector.broadcast %cst_51 : f32 to vector<2x32xf32>
      %96 = arith.addf %95, %94 : vector<2x32xf32>
      %97 = arith.divf %95, %96 : vector<2x32xf32>
      %98 = arith.mulf %89, %arg15 : vector<2x32xf32>
      %99 = arith.mulf %83, %91 : vector<2x32xf32>
      %100 = arith.addf %98, %99 : vector<2x32xf32>
      %101 = math.tanh %100 : vector<2x32xf32>
      %102 = arith.mulf %97, %101 : vector<2x32xf32>
      %cst_52 = arith.constant 0.000000e+00 : f32
      %103 = vector.shape_cast %31 : vector<2x1xi1> to vector<2x1xi1>
      %104 = vector.broadcast %103 : vector<2x1xi1> to vector<2x32xi1>
      %105 = vector.broadcast %cst_52 : f32 to vector<2x32xf32>
      %106 = arith.select %104, %69, %105 : vector<2x32xi1>, vector<2x32xf32>
      %107 = arith.index_cast %arg11 : i32 to index
      %c0_53 = arith.constant 0 : index
      %c0_54 = arith.constant 0 : index
      %108 = vector.load %arg9[%107, %c0_53, %c0_54] : memref<8x2x32xf32, #tpu.memory_space<vmem>>, vector<1x2x32xf32>
      %109 = vector.shape_cast %108 : vector<1x2x32xf32> to vector<2x32xf32>
      %110 = vector.shape_cast %106 : vector<2x32xf32> to vector<1x2x32xf32>
      tpu.vector_store %arg9[%107, %c0_53, %c0_54], %110 {strides = array<i32>} : memref<8x2x32xf32, #tpu.memory_space<vmem>>, vector<1x2x32xf32>,
      %cst_55 = arith.constant 0.000000e+00 : f32
      %111 = vector.shape_cast %36 : vector<2x1xi1> to vector<2x1xi1>
      %112 = vector.broadcast %111 : vector<2x1xi1> to vector<2x32xi1>
      %113 = vector.broadcast %cst_55 : f32 to vector<2x32xf32>
      %114 = arith.select %112, %102, %113 : vector<2x32xi1>, vector<2x32xf32>
      %115 = arith.index_cast %26 : i32 to index
      %c0_56 = arith.constant 0 : index
      %c0_57 = arith.constant 0 : index
      %116 = vector.load %arg10[%115, %c0_56, %c0_57] : memref<8x2x32xf32, #tpu.memory_space<vmem>>, vector<1x2x32xf32>
      %117 = vector.shape_cast %116 : vector<1x2x32xf32> to vector<2x32xf32>
      %118 = vector.shape_cast %114 : vector<2x32xf32> to vector<1x2x32xf32>
      tpu.vector_store %arg10[%115, %c0_56, %c0_57], %118 {strides = array<i32>} : memref<8x2x32xf32, #tpu.memory_space<vmem>>, vector<1x2x32xf32>,
      %119 = vector.shape_cast %31 : vector<2x1xi1> to vector<2x1xi1>
      %120 = vector.broadcast %119 : vector<2x1xi1> to vector<2x32xi1>
      %121 = arith.select %120, %69, %arg12 : vector<2x32xi1>, vector<2x32xf32>
      %122 = vector.shape_cast %31 : vector<2x1xi1> to vector<2x1xi1>
      %123 = vector.broadcast %122 : vector<2x1xi1> to vector<2x32xi1>
      %124 = arith.select %123, %67, %arg13 : vector<2x32xi1>, vector<2x32xf32>
      %125 = vector.shape_cast %36 : vector<2x1xi1> to vector<2x1xi1>
      %126 = vector.broadcast %125 : vector<2x1xi1> to vector<2x32xi1>
      %127 = arith.select %126, %102, %arg14 : vector<2x32xi1>, vector<2x32xf32>
      %128 = vector.shape_cast %36 : vector<2x1xi1> to vector<2x1xi1>
      %129 = vector.broadcast %128 : vector<2x1xi1> to vector<2x32xi1>
      %130 = arith.select %129, %100, %arg15 : vector<2x32xi1>, vector<2x32xf32>
      scf.yield %121, %124, %127, %130 : vector<2x32xf32>, vector<2x32xf32>, vector<2x32xf32>, vector<2x32xf32>
    }
    %c8_i32_22 = arith.constant 8 : i32
    %c0_23 = arith.constant 0 : index
    %c0_24 = arith.constant 0 : index
    %c0_25 = arith.constant 0 : index
    %22 = vector.load %arg9[%c0_23, %c0_24, %c0_25] : memref<8x2x32xf32, #tpu.memory_space<vmem>>, vector<8x2x32xf32>
    %c0_26 = arith.constant 0 : index
    %c0_27 = arith.constant 0 : index
    %c0_28 = arith.constant 0 : index
    %23 = vector.load %arg6[%c0_26, %c0_27, %c0_28] : memref<8x2x64xf32, #tpu.memory_space<vmem>>, vector<8x2x32xf32>
    tpu.vector_store %arg6[%c0_26, %c0_27, %c0_28], %22 {strides = array<i32>} : memref<8x2x64xf32, #tpu.memory_space<vmem>>, vector<8x2x32xf32>,
    %c0_29 = arith.constant 0 : index
    %c0_30 = arith.constant 0 : index
    %c0_31 = arith.constant 0 : index
    %24 = vector.load %arg10[%c0_29, %c0_30, %c0_31] : memref<8x2x32xf32, #tpu.memory_space<vmem>>, vector<8x2x32xf32>
    %c0_32 = arith.constant 0 : index
    %c0_33 = arith.constant 0 : index
    %c32 = arith.constant 32 : index
    %25 = vector.load %arg6[%c0_32, %c0_33, %c32] : memref<8x2x64xf32, #tpu.memory_space<vmem>>, vector<8x2x32xf32>
    tpu.vector_store %arg6[%c0_32, %c0_33, %c32], %24 {strides = array<i32>} : memref<8x2x64xf32, #tpu.memory_space<vmem>>, vector<8x2x32xf32>,
    return
  }
  func.func @transform_0(%arg0: i32) -> (i32, i32, i32) {
    %c0_i32 = arith.constant 0 : i32
    %c0_i32_0 = arith.constant 0 : i32
    %c0_i32_1 = arith.constant 0 : i32
    return %c0_i32, %arg0, %c0_i32_0 : i32, i32, i32
  }
  func.func @transform_1(%arg0: i32) -> (i32, i32, i32) {
    %c0_i32 = arith.constant 0 : i32
    %c0_i32_0 = arith.constant 0 : i32
    %c0_i32_1 = arith.constant 0 : i32
    return %c0_i32, %arg0, %c0_i32_0 : i32, i32, i32
  }
  func.func @transform_2(%arg0: i32) -> (i32, i32) {
    %c0_i32 = arith.constant 0 : i32
    %c0_i32_0 = arith.constant 0 : i32
    %c0_i32_1 = arith.constant 0 : i32
    return %c0_i32, %c0_i32_0 : i32, i32
  }
  func.func @transform_3(%arg0: i32) -> (i32, i32, i32) {
    %c0_i32 = arith.constant 0 : i32
    %c0_i32_0 = arith.constant 0 : i32
    %c0_i32_1 = arith.constant 0 : i32
    %c0_i32_2 = arith.constant 0 : i32
    return %c0_i32, %c0_i32_0, %c0_i32_1 : i32, i32, i32
  }
  func.func @transform_4(%arg0: i32) -> (i32, i32, i32) {
    %c0_i32 = arith.constant 0 : i32
    %c0_i32_0 = arith.constant 0 : i32
    %c0_i32_1 = arith.constant 0 : i32
    %c0_i32_2 = arith.constant 0 : i32
    return %c0_i32, %c0_i32_0, %c0_i32_1 : i32, i32, i32
  }
  func.func @transform_5(%arg0: i32) -> (i32, i32, i32) {
    %c0_i32 = arith.constant 0 : i32
    %c0_i32_0 = arith.constant 0 : i32
    %c0_i32_1 = arith.constant 0 : i32
    return %c0_i32, %arg0, %c0_i32_0 : i32, i32, i32
  }
}

</mosaic_0001>

<bundles_post_ra>
// kernel: tpu_custom_call.1
= control target key start
LH: loop header
LB: loop body
LE: loop exit
PB: predicated region body
PF: predicated region fallthrough
CT: control target
= control target key end

     0   :  { %10 = vsyncpa [#allocation7], 0  ;;  %s971_s0 = inlined_call_operand.vmem [shape: f32[8,2,32], index: 0, kind: input, shape index: {}]   ;;  %s972_s1 = inlined_call_operand.vmem [shape: f32[8,2,1], index: 1, kind: input, shape index: {}]   ;;  %s973_s2 = inlined_call_operand.hbm [shape: bf16[32,256], index: 2, kind: input, shape index: {}]   ;;  %s974_s3 = inlined_call_operand.hbm [shape: bf16[2,32,128], index: 3, kind: input, shape index: {}]   ;;  %s975_s4 = inlined_call_operand.vmem [shape: f32[2,1,128], index: 4, kind: input, shape index: {}]   ;;  %s976_s5 = inlined_call_operand.hbm [shape: f32[8,2,64], index: 5, kind: output, shape index: {}]  }
   0x1   :  { %11 = vsyncpa [#allocation10], 0 }
   0x2   :  { %12 = vsyncpa [#allocation8], 0  ;;  %s21_s20 = sshll.u32 %s973_s2, 4  ;;  %s754_s21 = smov [#allocation6]   ;;  %s22_s20 = int_to_ptr.hbm [resolvable:$true] %s21_s20 }
   0x3   :  { %s23_s22 = sshll.u32 %s754_s21, 4  ;;  %s34_s25 = sshll.u32 %s974_s3, 4  ;;  %s24_s22 = int_to_ptr.vmem [resolvable:$true] %s23_s22  ;;  %s35_s25 = int_to_ptr.hbm [resolvable:$true] %s34_s25 }
   0x4   :  { %s755_s26 = smov 128   ;;  %s756_s27 = smov 8  }
   0x5   :  { %29 = dma.hbm_to_vmem [thread:$0]  %s22_s20, 512, %s24_s22, [#allocation7], %s755_s26, %s755_s26, %s756_s27  }
   0x6   :  { %s757_s28 = smov [#allocation9]   ;;  %s758_s30 = smov 64  }
   0x7   :  { %s36_s29 = sshll.u32 %s757_s28, 4  ;;  %s759_s6 = smov 4   ;;  %s37_s29 = int_to_ptr.vmem [resolvable:$true] %s36_s29 }
   0x8   :  { %42 = dma.hbm_to_vmem [thread:$0]  %s35_s25, 512, %s37_s29, [#allocation10], %s758_s30, %s758_s30, %s759_s6  }
   0x9   :  { %728 = dma.done.wait [#allocation7], 512  }
   0xa   :  { %729 = vsyncadd [#allocation7], 4294966784 }
   0xb   :  { %730 = dma.done.wait [#allocation10], 512  }
   0xc   :  { %731 = vsyncadd [#allocation10], 4294966784  ;;  %v802_v0 = vld [vmem:[#allocation9] sm:$0xf]  ;;  %v804_v1 = vld [vmem:[#allocation9] sm:$0xf0] }
   0xd   :  { %v806_v2 = vld [vmem:[#allocation9 + $0x8] sm:$0xf]  ;;  %v808_v3 = vld [vmem:[#allocation9 + $0x8] sm:$0xf0]  ;;  %v810_v4 = vld [vmem:[#allocation9 + $0x10] sm:$0xf] }
   0xe   :  { %v812_v5 = vld [vmem:[#allocation9 + $0x10] sm:$0xf0]  ;;  %v814_v6 = vld [vmem:[#allocation9 + $0x18] sm:$0xf]  ;;  %v816_v7 = vld [vmem:[#allocation9 + $0x18] sm:$0xf0] }
   0xf   :  { %v821_v8 = vld [vmem:[%s975_s4] sm:$0x1]  ;;  %v826_v9 = vld [vmem:[%s975_s4 + $0x1] sm:$0x1]  ;;  %v527_v10 = vld [vmem:[#allocation6 + $0x10] sm:$0xf] }
  0x10   :  { %v561_v11 = vld [vmem:[#allocation6 + $0x14] sm:$0xf0]  ;;  %v560_v13 = vld [vmem:[#allocation6 + $0x14] sm:$0xf]  ;;  %v529_v14 = vld [vmem:[#allocation6 + $0x18] sm:$0xf0] }
  0x11   :  { %v528_v12 = vor.u32 %v561_v11, %v527_v10  ;;  %v519_v15 = vld [vmem:[#allocation6] sm:$0xf]  ;;  %v532_v16 = vor.u32 %v560_v13, %v529_v14  ;;  %v559_v17 = vld [vmem:[#allocation6 + $0x4] sm:$0xf0]  ;;  %v558_v18 = vld [vmem:[#allocation6 + $0x4] sm:$0xf] }
  0x12   :  { %v521_v19 = vld [vmem:[#allocation6 + $0x8] sm:$0xf0]  ;;  %v520_v20 = vor.u32 %v559_v17, %v519_v15  ;;  %v54_v21 = vld [vmem:[%s971_s0] sm:$0x3]  ;;  %v55_v22 = vld [vmem:[%s971_s0 + $0x2] sm:$0x3] }
  0x13   :  { %124 = vmatpush.bf16.msra.mxu0 %v528_v12  ;;  %138 = vmatpush.bf16.msra.mxu1 %v532_v16  ;;  %v524_v23 = vor.u32 %v558_v18, %v521_v19  ;;  %v56_v24 = vld [vmem:[%s971_s0 + $0x4] sm:$0x3]  ;;  %v57_v25 = vld [vmem:[%s971_s0 + $0x6] sm:$0x3]  ;;  %70 = vst [vmem:[#allocation1] ss:$4 sm:$0xff] %v54_v21 }
  0x14   :  { %v58_v26 = vld [vmem:[%s971_s0 + $0x8] sm:$0x3]  ;;  %72 = vst [vmem:[#allocation1 + $0x1] ss:$4 sm:$0xff] %v55_v22  ;;  %v59_v27 = vld [vmem:[%s971_s0 + $0xa] sm:$0x3] }
  0x15   :  { %74 = vst [vmem:[#allocation1 + $0x2] ss:$4 sm:$0xff] %v56_v24  ;;  %v60_v28 = vld [vmem:[%s971_s0 + $0xc] sm:$0x3]  ;;  %v61_v29 = vld [vmem:[%s971_s0 + $0xe] sm:$0x3] }
  0x16   :  { %76 = vst [vmem:[#allocation1 + $0x3] ss:$4 sm:$0xff] %v57_v25  ;;  %vm114_vm0 = vcmask 261120   ;;  %v854_v49 = vmov 0.0   ;;  %v856_v50 = vmov 0.0   ;;  %v858_v51 = vmov 0.0  }
  0x17   :  { %125 = vmatpush.bf16.msra.mxu0 %v520_v20  ;;  %139 = vmatpush.bf16.msra.mxu1 %v524_v23  ;;  %78 = vst [vmem:[#allocation1 + $0x20] ss:$4 sm:$0xff] %v58_v26  ;;  %v860_v52 = vmov 0.0   ;;  %s862_s0 = smov 0  }
  0x18   :  { %80 = vst [vmem:[#allocation1 + $0x21] ss:$4 sm:$0xff] %v59_v27 }
  0x19   :  { %82 = vst [vmem:[#allocation1 + $0x22] ss:$4 sm:$0xff] %v60_v28 }
  0x1a   :  { %84 = vst [vmem:[#allocation1 + $0x23] ss:$4 sm:$0xff] %v61_v29 }
  0x1d   :  { %v85_v30 = vld.sshfl [vmem:[#allocation1] sm:$0xff pattern:$0x73625140] }
  0x21   :  { %v86_v31 = vld.sshfl [vmem:[#allocation1 + $0x20] sm:$0xff pattern:$0x73625140] }
  0x22   :  { %v89_v32 = vpack.c.bf16 %v86_v31, %v85_v30 }
  0x24   :  { %533 = vmatmul.msk.bf16.vlgmr.msra.gmra.mxu0 %vm114_vm0, %v89_v32  ;;  %534 = vmatmul.msk.bf16.vlgmr.msra.gmra.mxu1 %vm114_vm0, %v89_v32 }
  0xa1   :  { %v127_v33 = vpop.f32.mrf.mxu0  ;;  %v141_v34 = vpop.f32.mrf.mxu1 }
  0xa2   :  { %v148_v35 = vrot.slane %v127_v33, 2  ;;  %v149_v36 = vrot.slane %v127_v33, 4  ;;  %v150_v37 = vrot.slane %v127_v33, 6  ;;  %160 = vst [vmem:[#allocation2] sm:$0x3] %v127_v33  ;;  %v170_v38 = vrot.slane %v141_v34, 2 }
  0xa3   :  { %182 = vst [vmem:[#allocation3] sm:$0x3] %v141_v34  ;;  %v171_v39 = vrot.slane %v141_v34, 4  ;;  %v172_v40 = vrot.slane %v141_v34, 6 }
  0xa4   :  { %161 = vst [vmem:[#allocation2 + $0x2] sm:$0x3] %v148_v35 }
  0xa5   :  { %162 = vst [vmem:[#allocation2 + $0x4] sm:$0x3] %v149_v36 }
  0xa6   :  { %163 = vst [vmem:[#allocation2 + $0x6] sm:$0x3] %v150_v37 }
  0xa7   :  { %183 = vst [vmem:[#allocation3 + $0x2] sm:$0x3] %v170_v38 }
  0xa8   :  { %184 = vst [vmem:[#allocation3 + $0x4] sm:$0x3] %v171_v39 }
  0xa9   :  { %185 = vst [vmem:[#allocation3 + $0x6] sm:$0x3] %v172_v40  ;;  %v129_v41 = vpop.f32.mrf.mxu0  ;;  %v143_v42 = vpop.f32.mrf.mxu1 }
  0xaa   :  { %v151_v43 = vrot.slane %v129_v41, 2  ;;  %v152_v44 = vrot.slane %v129_v41, 4  ;;  %v153_v45 = vrot.slane %v129_v41, 6  ;;  %164 = vst [vmem:[#allocation2 + $0x8] sm:$0x3] %v129_v41  ;;  %v173_v46 = vrot.slane %v143_v42, 2 }
  0xab   :  { %186 = vst [vmem:[#allocation3 + $0x8] sm:$0x3] %v143_v42  ;;  %v174_v47 = vrot.slane %v143_v42, 4  ;;  %v175_v48 = vrot.slane %v143_v42, 6 }
  0xac   :  { %165 = vst [vmem:[#allocation2 + $0xa] sm:$0x3] %v151_v43 }
  0xad   :  { %166 = vst [vmem:[#allocation2 + $0xc] sm:$0x3] %v152_v44 }
  0xae   :  { %167 = vst [vmem:[#allocation2 + $0xe] sm:$0x3] %v153_v45 }
  0xaf   :  { %187 = vst [vmem:[#allocation3 + $0xa] sm:$0x3] %v173_v46 }
  0xb0   :  { %188 = vst [vmem:[#allocation3 + $0xc] sm:$0x3] %v174_v47 }
  0xb1   :  { %189 = vst [vmem:[#allocation3 + $0xe] sm:$0x3] %v175_v48 }
  0xb2 LB: > { %v545_v53 = vor.u32 %v808_v3, %v806_v2  ;;  %v223_v54 = vpack.c.bf16 %v748_v52, %v748_v52  ;;  %v541_v55 = vor.u32 %v804_v1, %v802_v0  ;;  %s760_s24 = smov 32   ;;  %v299_v56 = vpack.c.bf16 %v740_v50, %v740_v50  ;;  %s896_s25 = sshll.u32 %s752_s0, 1  ;;  %s752_s0 = sphi %s862_s0, %s207_s0   ;;  %v748_v52 = vphi %v860_v52, %v398_v52   ;;  %v744_v51 = vphi %v858_v51, %v399_v51   ;;  %v740_v50 = vphi %v856_v50, %v400_v50   ;;  %v736_v49 = vphi %v854_v49, %v401_v49  }
  0xb3   : > { %v555_v57 = vor.u32 %v816_v7, %v814_v6  ;;  %v551_v58 = vor.u32 %v812_v5, %v810_v4  ;;  %s212_s26 = ssub.s32 7, %s752_s0  ;;  %s221_s27 = scalar_lea.vmem [#allocation2], %s896_s25  ;;  %v257_v62 = vperm.slane %v821_v8, 0  ;;  %v333_v13 = vperm.slane %v826_v9, 0 }
  0xb4   : > { %248 = vmatpush.bf16.msra.mxu0 %v545_v53  ;;  %225 = vrot.lane.b32.xlu0 %v223_v54, %s760_s24  ;;  %s901_s28 = sshll.u32 %s212_s26, 1  ;;  %s761_s30 = smov 64   ;;  %v762_v28 = vmov 0   ;;  %vm384_vm13 = vcmask 254976  }
  0xb5   : > { %324 = vmatpush.bf16.msra.mxu1 %v555_v57  ;;  %v222_v61 = vld [vmem:[%s221_s27] sm:$0x3]  ;;  %s297_s29 = scalar_lea.vmem [#allocation3], %s901_s28  ;;  %618 = vset.pattern.permute.xlu2 %v762_v28  ;;  %s214_s3 = scalar_lea.vmem %s972_s1, %s896_s25 }
  0xb6   : > { %619 = vset.pattern.permute.xlu0 %v762_v28  ;;  %s218_s9 = scalar_lea.vmem %s972_s1, %s901_s28  ;;  %s396_s10 = scalar_lea.vmem [#allocation5], %s901_s28 }
  0xb7   : > { %s383_s11 = scalar_lea.vmem [#allocation4], %s896_s25  ;;  %s207_s0 = sadd.s32 1, %s752_s0  }
  0xb8   : > { %249 = vmatpush.bf16.msra.mxu0 %v541_v55  ;;  %v298_v12 = vld [vmem:[%s297_s29] sm:$0x3]  ;;  %p204_p0 = scmp.ge.s32.totalorder %s207_s0, 8  }
  0xb9   : > { %325 = vmatpush.bf16.msra.mxu1 %v551_v58  ;;  %s763_s12 = smov (%p204_p0), 32   ;;  %vm459_vm14 = vcmask (%p204_p0), 517376   ;;  %s764_s1 = smov (%p204_p0), [#allocation11]  }
  0xba   :  { %s472_s4 = sshll.u32 (%p204_p0), %s764_s1, 4  ;;  %s474_s15 = sshll.u32 (%p204_p0), %s976_s5, 4  ;;  %s473_s4 = int_to_ptr.vmem [resolvable:$true] %s472_s4  ;;  %s475_s15 = int_to_ptr.hbm [resolvable:$true] %s474_s15 }
  0xbb   :  { %s765_s16 = smov (%p204_p0), 2  }
  0xbc   : > { %301 = vrot.lane.b32.xlu0 %v299_v56, %s760_s24  ;;  %v215_v56 = vld [vmem:[%s214_s3] sm:$0x3] }
  0xbd   : > { %vm216_vm9 = vcmp.gt.f32.partialorder %v215_v56, 0.0 }
  0xbe   : > { %v373_v57 = vsel %vm216_vm9, 1, %v762_v28 }
 0x126   : > { %v226_v59 = vpop.permute.xlu0 %225 }
 0x127   : > { %546 = vmatmul.msk.bf16.vlgmr.msra.gmra.mxu0 %vm114_vm0, %v226_v59 }
 0x12e   : > { %v302_v60 = vpop.permute.xlu0 %301 }
 0x12f   : > { %556 = vmatmul.msk.bf16.vlgmr.msra.gmra.mxu1 %vm114_vm0, %v302_v60 }
 0x1a4   : > { %v251_v63 = vpop.f32.mrf.mxu0 }
 0x1a5   : > { %v255_v10 = vadd.f32 %v251_v63, %v222_v61 }
 0x1a7   : > { %v259_v11 = vadd.f32 %v257_v62, %v255_v10 }
 0x1a9   : > { %620 = vtanh.f32 %v259_v11  ;;  %v547_v21 = vmul.f32 -1.442695, %v259_v11  ;;  %v219_v11 = vld [vmem:[%s218_s9] sm:$0x3] }
 0x1aa   : > { %vm220_vm10 = vcmp.gt.f32.partialorder %v219_v11, 0.0 }
 0x1ac   : > { %v253_v14 = vpop.f32.mrf.mxu0  ;;  %v327_v15 = vpop.f32.mrf.mxu1 }
 0x1ad   : > { %v331_v16 = vadd.f32 %v327_v15, %v298_v12  ;;  %v386_v12 = vsel %vm220_vm10, 1, %v762_v28 }
 0x1af   : > { %v621_v17 = vpop.eup %620  ;;  %v335_v18 = vadd.f32 %v333_v13, %v331_v16 }
 0x1b0   : > { %282 = vrot.lane.b32.xlu1 %v621_v17, %s761_s30 }
 0x1b1   : > { %622 = vtanh.f32 %v335_v18  ;;  %v557_v22 = vmul.f32 -1.442695, %v335_v18 }
 0x1b2   : > { %624 = vpow2.f32 %v547_v21 }
 0x1b3   : > { %626 = vpow2.f32 %v557_v22 }
 0x1b4   : > { %v329_v19 = vpop.f32.mrf.mxu1 }
 0x1b7   : > { %v623_v20 = vpop.eup %622 }
 0x1b8   : > { %358 = vrot.lane.b32.xlu1 %v623_v20, %s761_s30  ;;  %v625_v23 = vpop.eup %624 }
 0x1b9   : > { %v263_v24 = vadd.f32 1.0, %v625_v23  ;;  %v627_v25 = vpop.eup %626 }
 0x1ba   : > { %v339_v26 = vadd.f32 1.0, %v627_v25 }
 0x1bb   : > { %628 = vrcp.f32 %v263_v24  ;;  %v275_v36 = vand.u32 2147483648, %v263_v24  ;;  %vm269_vm2 = vweird.f32 %v263_v24  ;;  %v273_v37 = vand.u32 2147483647, %v263_v24 }
 0x1bc   : > { %630 = vrcp.f32 %v339_v26  ;;  %vm345_vm5 = vweird.f32 %v339_v26  ;;  %v351_v43 = vand.u32 2147483648, %v339_v26  ;;  %v349_v46 = vand.u32 2147483647, %v339_v26 }
 0x1bd   : > { %v276_v40 = vor.u32 1.1754944e-38, %v275_v36  ;;  %vm274_vm4 = vcmp.eq.f32.partialorder %v273_v37, 8.507059e+37 }
 0x1be   : > { %v352_v47 = vor.u32 1.1754944e-38, %v351_v43  ;;  %vm350_vm8 = vcmp.eq.f32.partialorder %v349_v46, 8.507059e+37 }
 0x1c1   : > { %v629_v27 = vpop.eup %628 }
 0x1c2   : > { %v265_v29 = vmul.f32 %v629_v27, %v263_v24  ;;  %v631_v31 = vpop.eup %630  ;;  %vm270_vm1 = vweird.f32 %v629_v27 }
 0x1c3   : > { %v341_v33 = vmul.f32 %v631_v31, %v339_v26  ;;  %vm271_vm3 = vmor %vm269_vm2, %vm270_vm1  ;;  %vm346_vm6 = vweird.f32 %v631_v31 }
 0x1c4   : > { %v266_v30 = vsub.f32 1.0, %v265_v29  ;;  %vm347_vm7 = vmor %vm345_vm5, %vm346_vm6 }
 0x1c5   : > { %v342_v35 = vsub.f32 1.0, %v341_v33 }
 0x1c6   : > { %v267_v32 = vmul.f32 %v629_v27, %v266_v30 }
 0x1c7   : > { %v343_v39 = vmul.f32 %v631_v31, %v342_v35 }
 0x1c8   : > { %v268_v34 = vadd.f32 %v629_v27, %v267_v32 }
 0x1c9   : > { %v344_v45 = vadd.f32 %v631_v31, %v343_v39 }
 0x1ca   : > { %v272_v38 = vsel %vm271_vm3, %v629_v27, %v268_v34 }
 0x1cb   : > { %v277_v42 = vsel %vm274_vm4, %v276_v40, %v272_v38  ;;  %v348_v48 = vsel %vm347_vm7, %v631_v31, %v344_v45 }
 0x1cc   : > { %v353_v54 = vsel %vm350_vm8, %v352_v47, %v348_v48  ;;  %v280_v58 = vmul.f32 %v744_v51, %v277_v42 }
 0x1cd   : > { %v356_v61 = vmul.f32 %v736_v49, %v353_v54 }
 0x222   : > { %v283_v41 = vpop.permute.xlu1 %282 }
 0x223   : > { %v285_v44 = vmul.f32 %v283_v41, %v277_v42 }
 0x225   : > { %287 = vrot.lane.b32.xlu2 %v285_v44, %s760_s24 }
 0x22a   : > { %v359_v53 = vpop.permute.xlu1 %358 }
 0x22b   : > { %v361_v55 = vmul.f32 %v359_v53, %v353_v54 }
 0x22d   : > { %363 = vrot.lane.b32.xlu2 %v361_v55, %s760_s24 }
 0x235   : > { %375 = vperm.xlu2 %618, %v373_v57  }
 0x27f   : > { %v288_v59 = vpop.permute.xlu2 %287 }
 0x280   : > { %v290_v60 = vadd.f32 %v288_v59, %v280_v58 }
 0x282   : > { %632 = vtanh.f32 %v290_v60 }
 0x287   : > { %v364_v62 = vpop.permute.xlu2 %363 }
 0x288   : > { %v633_v63 = vpop.eup %632  ;;  %v366_v10 = vadd.f32 %v364_v62, %v356_v61 }
 0x289   : > { %293 = vrot.lane.b32.xlu0 %v633_v63, %s761_s30 }
 0x28a   : > { %634 = vtanh.f32 %v366_v10 }
 0x28f   : > { %v376_v13 = vpop.permute.xlu2 %375 }
 0x290   : > { %v635_v14 = vpop.eup %634  ;;  %vm377_vm11 = vcmp.eq.s32.totalorder %v376_v13, 1 }
 0x291   : > { %v399_v51 = vsel %vm377_vm11, %v290_v60, %v744_v51   ;;  %388 = vperm.xlu0 %619, %v386_v12   ;;  %369 = vrot.lane.b32.xlu1 %v635_v14, %s761_s30 }
 0x2fb   : > { %v294_v15 = vpop.permute.xlu0 %293 }
 0x2fc   : > { %v296_v16 = vmul.f32 %v294_v15, %v277_v42 }
 0x2fe   : > { %v398_v52 = vsel %vm377_vm11, %v296_v16, %v748_v52   ;;  %v378_v17 = vsel %vm377_vm11, %v296_v16, 0.0 }
 0x2ff   : > { %380 = vrot.lane.b32.xlu1 %v378_v17, %s760_s24 }
 0x303   : > { %v389_v18 = vpop.permute.xlu0 %388  ;;  %v370_v19 = vpop.permute.xlu1 %369 }
 0x304   : > { %vm390_vm12 = vcmp.eq.s32.totalorder %v389_v18, 1  ;;  %v372_v20 = vmul.f32 %v370_v19, %v353_v54 }
 0x305   : > { %v401_v49 = vsel %vm390_vm12, %v366_v10, %v736_v49  }
 0x306   : > { %v400_v50 = vsel %vm390_vm12, %v372_v20, %v740_v50   ;;  %v391_v21 = vsel %vm390_vm12, %v372_v20, 0.0 }
 0x307   : > { %393 = vrot.lane.b32.xlu2 %v391_v21, %s760_s24 }
 0x361   : > { %v394_v22 = vpop.permute.xlu2 %393 }
 0x362   : > { %397 = vst.msk [vmem:[%s396_s10] sm:$0x3] %vm384_vm13, %v394_v22 }
 0x369   :  { %v421_v24 = vld [vmem:[#allocation5 + $0x4] sm:$0x3] (%p204_p0)  ;;  %v419_v25 = vld [vmem:[#allocation5] sm:$0x3] (%p204_p0)  ;;  %v423_v26 = vld [vmem:[#allocation5 + $0x8] sm:$0x3] (%p204_p0) }
 0x36a   :  { %439 = vrot.lane.b32.xlu1 (%p204_p0), %v421_v24, %s763_s12  ;;  %435 = vrot.lane.b32.xlu0 (%p204_p0), %v419_v25, %s763_s12  ;;  %v422_v27 = vld [vmem:[#allocation5 + $0x6] sm:$0x3] (%p204_p0)  ;;  %v420_v28 = vld [vmem:[#allocation5 + $0x2] sm:$0x3] (%p204_p0)  ;;  %v424_v29 = vld [vmem:[#allocation5 + $0xa] sm:$0x3] (%p204_p0) }
 0x36b   :  { %443 = vrot.lane.b32.xlu2 (%p204_p0), %v423_v26, %s763_s12  ;;  %v426_v52 = vld [vmem:[#allocation5 + $0xe] sm:$0x3] (%p204_p0)  ;;  %v425_v0 = vld [vmem:[#allocation5 + $0xc] sm:$0x3] (%p204_p0) }
 0x36e   :  { %206 = sbr.rel (!%p204_p0) target bundleno = 178 (0xb2), region = 70 }
 0x371   : > { %v381_v23 = vpop.permute.xlu1 %380 }
 0x372   : > { %385 = vst.msk [vmem:[%s383_s11] sm:$0x3] %vm384_vm13, %v381_v23  ;;  %441 = vrot.lane.b32.xlu1 (%p204_p0), %v422_v27, %s763_s12  ;;  %437 = vrot.lane.b32.xlu0 (%p204_p0), %v420_v28, %s763_s12 }
 0x373   :  { %445 = vrot.lane.b32.xlu2 %v424_v29, %s763_s12 }
 0x379   :  { %v404_v1 = vld [vmem:[#allocation4 + $0x4] sm:$0x3]  ;;  %v402_v2 = vld [vmem:[#allocation4] sm:$0x3]  ;;  %v406_v3 = vld [vmem:[#allocation4 + $0x8] sm:$0x3] }
 0x37a   :  { %449 = vrot.lane.b32.xlu1 %v426_v52, %s763_s12  ;;  %447 = vrot.lane.b32.xlu0 %v425_v0, %s763_s12  ;;  %413 = vst.msk [vmem:[#allocation11 + $0x4] sm:$0x3] %vm384_vm13, %v404_v1  ;;  %v405_v4 = vld [vmem:[#allocation4 + $0x6] sm:$0x3]  ;;  %v403_v5 = vld [vmem:[#allocation4 + $0x2] sm:$0x3] }
 0x37b   :  { %411 = vst.msk [vmem:[#allocation11] sm:$0x3] %vm384_vm13, %v402_v2  ;;  %v407_v7 = vld [vmem:[#allocation4 + $0xa] sm:$0x3]  ;;  %v409_v8 = vld [vmem:[#allocation4 + $0xe] sm:$0x3] }
 0x37c   :  { %415 = vst.msk [vmem:[#allocation11 + $0x8] sm:$0x3] %vm384_vm13, %v406_v3  ;;  %v408_v9 = vld [vmem:[#allocation4 + $0xc] sm:$0x3] }
 0x37d   :  { %414 = vst.msk [vmem:[#allocation11 + $0x6] sm:$0x3] %vm384_vm13, %v405_v4 }
 0x37e   :  { %412 = vst.msk [vmem:[#allocation11 + $0x2] sm:$0x3] %vm384_vm13, %v403_v5 }
 0x37f   :  { %416 = vst.msk [vmem:[#allocation11 + $0xa] sm:$0x3] %vm384_vm13, %v407_v7 }
 0x380   :  { %418 = vst.msk [vmem:[#allocation11 + $0xe] sm:$0x3] %vm384_vm13, %v409_v8 }
 0x381   :  { %417 = vst.msk [vmem:[#allocation11 + $0xc] sm:$0x3] %vm384_vm13, %v408_v9 }
 0x3c5   :  { %v444_v6 = vpop.permute.xlu2 %443 }
 0x3c6   :  { %464 = vst.msk [vmem:[#allocation11 + $0x8] sm:$0x3] %vm459_vm14, %v444_v6 }
 0x3cd   :  { %v446_v49 = vpop.permute.xlu2 %445 }
 0x3ce   :  { %465 = vst.msk [vmem:[#allocation11 + $0xa] sm:$0x3] %vm459_vm14, %v446_v49 }
 0x3dc   :  { %v440_v50 = vpop.permute.xlu1 %439  ;;  %v436_v51 = vpop.permute.xlu0 %435 }
 0x3dd   :  { %462 = vst.msk [vmem:[#allocation11 + $0x4] sm:$0x3] %vm459_vm14, %v440_v50 }
 0x3de   :  { %460 = vst.msk [vmem:[#allocation11] sm:$0x3] %vm459_vm14, %v436_v51 }
 0x3e4   :  { %v442_v30 = vpop.permute.xlu1 %441  ;;  %v438_v31 = vpop.permute.xlu0 %437 }
 0x3e5   :  { %463 = vst.msk [vmem:[#allocation11 + $0x6] sm:$0x3] %vm459_vm14, %v442_v30 }
 0x3e6   :  { %461 = vst.msk [vmem:[#allocation11 + $0x2] sm:$0x3] %vm459_vm14, %v438_v31 }
 0x3ec   :  { %v450_v32 = vpop.permute.xlu1 %449  ;;  %v448_v33 = vpop.permute.xlu0 %447 }
 0x3ed   :  { %467 = vst.msk [vmem:[#allocation11 + $0xe] sm:$0x3] %vm459_vm14, %v450_v32 }
 0x3ee   :  { %466 = vst.msk [vmem:[#allocation11 + $0xc] sm:$0x3] %vm459_vm14, %v448_v33 }
 0x3ef   :  { %480 = dma.vmem_to_hbm [thread:$0]  %s473_s4, 256, %s475_s15, [#allocation8], %s763_s12, %s763_s12, %s765_s16  }
 0x3f0   :  { %732 = dma.done.wait [#allocation8], 256  }
 0x3f1   :  { %733 = vsyncadd [#allocation8], 4294967040 }
 0x3f2   :  { %485 = vsyncpa [#allocation7], 1 }
 0x3f3   :  { %486 = vsyncpa [#allocation10], 1 }
 0x3f4   :  { %487 = vsyncpa [#allocation8], 1 }

</bundles_post_ra>
